<compile_context>
chip_gen: v6e
topology: v6e:2x2x1
jax: 0.10.0
libtpu: 0.0.40
codegen_flags: <defaults>
</compile_context>

<pallas_src>
import jax
import jax.numpy as jnp
from jax import lax
from jax.experimental import pallas as pl
from jax.experimental.pallas import tpu as pltpu


def mlp_head_kernel(x_ref, w1_ref, b1_ref, w2_ref, b2_ref, ones_ref, o_ref):
    # ---- Linear 1 + ReLU (bf16 MXU inputs, f32 accumulation) ----
    x_bf = x_ref[...].astype(jnp.bfloat16)                       # (tile_r, F)
    h = jnp.dot(x_bf, w1_ref[...], preferred_element_type=jnp.float32)
    h = jnp.maximum(h + b1_ref[...], 0.0)                        # (tile_r, G*H)

    # ---- Linear 2 ----
    y = jnp.dot(h.astype(jnp.bfloat16), w2_ref[...],
                preferred_element_type=jnp.float32)
    y = y + b2_ref[...]                                          # (tile_r, F)

    # ---- F.normalize(y, dim=-1) per original row (= per D-lane group) ----
    # Grouped sum of squares via a block-diagonal ones matmul keeps the whole
    # path lane-dense (no reshapes / masked reductions).
    sumsq = jnp.dot(y * y, ones_ref[...], preferred_element_type=jnp.float32)
    inv = lax.rsqrt(jnp.maximum(sumsq, 1e-24))   # == 1 / max(||y||, 1e-12)
    o_ref[...] = (y * inv).astype(o_ref.dtype)


def mlp_head(x, w1, b1, w2, b2, *, tile_rows=8192, out_dtype=None):
    """x: (N, D) f32/bf16; w1: (D, H); b1: (1, H) or (H,); w2: (H, D); b2: (1, D) or (D,)."""
    N, D = x.shape
    H = w1.shape[1]
    out_dtype = x.dtype if out_dtype is None else out_dtype

    # Lane-packing factor: G original rows side by side fill the 128-lane vreg.
    G = 128 // D if (D < 128 and 128 % D == 0) else 1
    F = G * D          # packed feature width (128 when packing)
    Hp = G * H         # packed hidden width

    # Block-diagonal weights / tiled biases, built once outside the kernel.
    eye = jnp.eye(G, dtype=jnp.float32)
    w1f = w1.astype(jnp.float32)
    w2f = w2.astype(jnp.float32)
    w1b = jnp.kron(eye, w1f).astype(jnp.bfloat16)                  # (F, Hp)
    w2b = jnp.kron(eye, w2f).astype(jnp.bfloat16)                  # (Hp, F)
    b1b = jnp.tile(b1.reshape(1, H).astype(jnp.float32), (1, G))   # (1, Hp)
    b2b = jnp.tile(b2.reshape(1, D).astype(jnp.float32), (1, G))   # (1, F)
    ones_blk = jnp.kron(eye, jnp.ones((D, D), jnp.float32))        # (F, F)

    # Pad rows so packed rows are a multiple of 8 (sublane granularity), then
    # fold G rows per 128-lane super-row (free reshape of a contiguous array).
    row_unit = 8 * G
    Np = ((N + row_unit - 1) // row_unit) * row_unit
    if Np != N:
        x = jnp.pad(x, ((0, Np - N), (0, 0)))
    R = Np // G
    xs = x.reshape(R, F)

    # Large row tiles: amortize per-step overhead; VMEM stays tiny on all gens.
    tile_r = max(8, min(R, max(1, tile_rows // G)))
    tile_r = (tile_r // 8) * 8
    grid = (pl.cdiv(R, tile_r),)

    row_spec = pl.BlockSpec((tile_r, F), lambda i: (i, 0))          # x / out tiles
    resident = lambda shape: pl.BlockSpec(shape, lambda i: (0, 0))  # weights/biases

    out = pl.pallas_call(
        mlp_head_kernel,
        out_shape=jax.ShapeDtypeStruct((R, F), out_dtype),
        grid=grid,
        in_specs=[
            row_spec,            # packed x
            resident((F, Hp)),   # W1 block-diag (bf16, VMEM-resident)
            resident((1, Hp)),   # b1 tiled (f32)
            resident((Hp, F)),   # W2 block-diag (bf16)
            resident((1, F)),    # b2 tiled (f32)
            resident((F, F)),    # grouped-sum indicator (f32)
        ],
        out_specs=row_spec,
        compiler_params=pltpu.CompilerParams(
            dimension_semantics=("parallel",),   # v7x: split row tiles across TCs
        ),
    )(xs, w1b, b1b, w2b, b2b, ones_blk)

    # Unpack super-rows back to (Np, D), drop padded rows.
    return out.reshape(Np, D)[:N]


def init_linear(key, fan_in, fan_out):
    # PyTorch nn.Linear default init: U(-1/sqrt(fan_in), 1/sqrt(fan_in))
    kw, kb = jax.random.split(key)
    bound = 1.0 / jnp.sqrt(fan_in)
    w = jax.random.uniform(kw, (fan_in, fan_out), jnp.float32, -bound, bound)
    b = jax.random.uniform(kb, (1, fan_out), jnp.float32, -bound, bound)
    return w, b


if __name__ == "__main__":
    # config: mlp_layer_num=2, out_feature_dim=32, mlphead_hidden_unit=64
    # N=250 (not a multiple of the row unit) exercises the pad/slice path and,
    # with tile_rows=128, a 2-step row-tiled grid.
    N, D, H = 250, 32, 64

    key = jax.random.PRNGKey(0)
    kx, k1, k2 = jax.random.split(key, 3)

    x = jax.random.normal(kx, (N, D), jnp.float32)
    w1, b1 = init_linear(k1, D, H)
    w2, b2 = init_linear(k2, H, D)

    out = mlp_head(x, w1, b1, w2, b2, tile_rows=128)
    out = jax.block_until_ready(out)

    # Pure-JAX f32 reference (kernel uses bf16 MXU inputs, so tolerance is loose).
    ref = jnp.maximum(x @ w1 + b1, 0.0) @ w2 + b2
    ref = ref / jnp.maximum(
        jnp.sqrt(jnp.sum(ref * ref, axis=-1, keepdims=True)), 1e-12
    )
    assert out.shape == (N, D)
    assert jnp.allclose(out, ref, atol=2e-2, rtol=2e-2)
    # rows must be (approximately) unit-norm after F.normalize
    row_norms = jnp.sqrt(jnp.sum(out.astype(jnp.float32) ** 2, axis=-1))
    assert jnp.allclose(row_norms, jnp.ones_like(row_norms), atol=1e-2)

    print("KERNEL_OK")
</pallas_src>

<mosaic_0001>
module attributes {stable_mosaic.version = 11 : i64} {
  func.func @mlp_head_kernel(%arg0: i32, %arg1: memref<32x128xf32, #tpu.memory_space<vmem>>, %arg2: memref<128x256xbf16, #tpu.memory_space<vmem>>, %arg3: memref<1x256xf32, #tpu.memory_space<vmem>>, %arg4: memref<256x128xbf16, #tpu.memory_space<vmem>>, %arg5: memref<1x128xf32, #tpu.memory_space<vmem>>, %arg6: memref<128x128xf32, #tpu.memory_space<vmem>>, %arg7: memref<32x128xf32, #tpu.memory_space<vmem>>) attributes {dimension_semantics = [#tpu.dimension_semantics<parallel>], iteration_bounds = array<i64: 2>, scalar_prefetch = 0 : i64, scratch_operands = 0 : i64, tpu.core_type = #tpu.core_type<tc>, window_params = [{transform_indices = @transform_0, window_bounds = array<i64: 32, 128>}, {pipeline_mode = #tpu.pipeline_mode<synchronous>, transform_indices = @transform_1, window_bounds = array<i64: 128, 256>}, {pipeline_mode = #tpu.pipeline_mode<synchronous>, transform_indices = @transform_2, window_bounds = array<i64: 1, 256>}, {pipeline_mode = #tpu.pipeline_mode<synchronous>, transform_indices = @transform_3, window_bounds = array<i64: 256, 128>}, {pipeline_mode = #tpu.pipeline_mode<synchronous>, transform_indices = @transform_4, window_bounds = array<i64: 1, 128>}, {pipeline_mode = #tpu.pipeline_mode<synchronous>, transform_indices = @transform_5, window_bounds = array<i64: 128, 128>}, {transform_indices = @transform_6, window_bounds = array<i64: 32, 128>}]} {
    %c0 = arith.constant 0 : index
    %c0_0 = arith.constant 0 : index
    %0 = vector.load %arg1[%c0, %c0_0] : memref<32x128xf32, #tpu.memory_space<vmem>>, vector<32x128xf32>
    %1 = arith.truncf %0 : vector<32x128xf32> to vector<32x128xbf16>
    %c0_1 = arith.constant 0 : index
    %c0_2 = arith.constant 0 : index
    %2 = vector.load %arg2[%c0_1, %c0_2] : memref<128x256xbf16, #tpu.memory_space<vmem>>, vector<128x256xbf16>
    %cst = arith.constant dense<0.000000e+00> : vector<32x256xf32>
    %3 = tpu.matmul %1, %2, %cst {dimension_numbers = #tpu.dot_dimension_numbers<[1], [0], [0], [1], [0, 0, 1, 1], [], []>} : vector<32x128xbf16>, vector<128x256xbf16>, vector<32x256xf32> -> vector<32x256xf32>
    %c0_3 = arith.constant 0 : index
    %c0_4 = arith.constant 0 : index
    %4 = vector.load %arg3[%c0_3, %c0_4] : memref<1x256xf32, #tpu.memory_space<vmem>>, vector<1x256xf32>
    %5 = vector.broadcast %4 : vector<1x256xf32> to vector<32x256xf32>
    %6 = arith.addf %3, %5 : vector<32x256xf32>
    %cst_5 = arith.constant 0.000000e+00 : f32
    %7 = vector.broadcast %cst_5 : f32 to vector<32x256xf32>
    %8 = arith.maximumf %6, %7 : vector<32x256xf32>
    %9 = arith.truncf %8 : vector<32x256xf32> to vector<32x256xbf16>
    %c0_6 = arith.constant 0 : index
    %c0_7 = arith.constant 0 : index
    %10 = vector.load %arg4[%c0_6, %c0_7] : memref<256x128xbf16, #tpu.memory_space<vmem>>, vector<256x128xbf16>
    %cst_8 = arith.constant dense<0.000000e+00> : vector<32x128xf32>
    %11 = tpu.matmul %9, %10, %cst_8 {dimension_numbers = #tpu.dot_dimension_numbers<[1], [0], [0], [1], [0, 0, 1, 1], [], []>} : vector<32x256xbf16>, vector<256x128xbf16>, vector<32x128xf32> -> vector<32x128xf32>
    %c0_9 = arith.constant 0 : index
    %c0_10 = arith.constant 0 : index
    %12 = vector.load %arg5[%c0_9, %c0_10] : memref<1x128xf32, #tpu.memory_space<vmem>>, vector<1x128xf32>
    %13 = vector.broadcast %12 : vector<1x128xf32> to vector<32x128xf32>
    %14 = arith.addf %11, %13 : vector<32x128xf32>
    %15 = arith.mulf %14, %14 : vector<32x128xf32>
    %c0_11 = arith.constant 0 : index
    %c0_12 = arith.constant 0 : index
    %16 = vector.load %arg6[%c0_11, %c0_12] : memref<128x128xf32, #tpu.memory_space<vmem>>, vector<128x128xf32>
    %cst_13 = arith.constant dense<0.000000e+00> : vector<32x128xf32>
    %17 = tpu.matmul %15, %16, %cst_13 {dimension_numbers = #tpu.dot_dimension_numbers<[1], [0], [0], [1], [0, 0, 1, 1], [], []>} : vector<32x128xf32>, vector<128x128xf32>, vector<32x128xf32> -> vector<32x128xf32>
    %cst_14 = arith.constant 1.000000e-24 : f32
    %18 = vector.broadcast %cst_14 : f32 to vector<32x128xf32>
    %19 = arith.maximumf %17, %18 : vector<32x128xf32>
    %20 = math.rsqrt %19 : vector<32x128xf32>
    %21 = arith.mulf %14, %20 : vector<32x128xf32>
    %c0_15 = arith.constant 0 : index
    %c0_16 = arith.constant 0 : index
    %22 = vector.load %arg7[%c0_15, %c0_16] : memref<32x128xf32, #tpu.memory_space<vmem>>, vector<32x128xf32>
    tpu.vector_store %arg7[%c0_15, %c0_16], %21 {strides = array<i32>} : memref<32x128xf32, #tpu.memory_space<vmem>>, vector<32x128xf32>,
    return
  }
  func.func @transform_0(%arg0: i32) -> (i32, i32) {
    %c0_i32 = arith.constant 0 : i32
    %c0_i32_0 = arith.constant 0 : i32
    return %arg0, %c0_i32 : i32, i32
  }
  func.func @transform_1(%arg0: i32) -> (i32, i32) {
    %c0_i32 = arith.constant 0 : i32
    %c0_i32_0 = arith.constant 0 : i32
    %c0_i32_1 = arith.constant 0 : i32
    return %c0_i32, %c0_i32_0 : i32, i32
  }
  func.func @transform_2(%arg0: i32) -> (i32, i32) {
    %c0_i32 = arith.constant 0 : i32
    %c0_i32_0 = arith.constant 0 : i32
    %c0_i32_1 = arith.constant 0 : i32
    return %c0_i32, %c0_i32_0 : i32, i32
  }
  func.func @transform_3(%arg0: i32) -> (i32, i32) {
    %c0_i32 = arith.constant 0 : i32
    %c0_i32_0 = arith.constant 0 : i32
    %c0_i32_1 = arith.constant 0 : i32
    return %c0_i32, %c0_i32_0 : i32, i32
  }
  func.func @transform_4(%arg0: i32) -> (i32, i32) {
    %c0_i32 = arith.constant 0 : i32
    %c0_i32_0 = arith.constant 0 : i32
    %c0_i32_1 = arith.constant 0 : i32
    return %c0_i32, %c0_i32_0 : i32, i32
  }
  func.func @transform_5(%arg0: i32) -> (i32, i32) {
    %c0_i32 = arith.constant 0 : i32
    %c0_i32_0 = arith.constant 0 : i32
    %c0_i32_1 = arith.constant 0 : i32
    return %c0_i32, %c0_i32_0 : i32, i32
  }
  func.func @transform_6(%arg0: i32) -> (i32, i32) {
    %c0_i32 = arith.constant 0 : i32
    %c0_i32_0 = arith.constant 0 : i32
    return %arg0, %c0_i32 : i32, i32
  }
}

</mosaic_0001>

<bundles_post_ra>
// kernel: tpu_custom_call.1
= control target key start
LH: loop header
LB: loop body
LE: loop exit
PB: predicated region body
PF: predicated region fallthrough
CT: control target
= control target key end

     0   :  { %11 = vsyncpa [#allocation3], 0  ;;  %s1716_s0 = inlined_call_operand.hbm [shape: f32[64,128], index: 0, kind: input, shape index: {}]   ;;  %s1717_s1 = inlined_call_operand.hbm [shape: bf16[128,256], index: 1, kind: input, shape index: {}]   ;;  %s1718_s2 = inlined_call_operand.vmem [shape: f32[1,256], index: 2, kind: input, shape index: {}]   ;;  %s1719_s3 = inlined_call_operand.hbm [shape: bf16[256,128], index: 3, kind: input, shape index: {}]   ;;  %s1720_s4 = inlined_call_operand.vmem [shape: f32[1,128], index: 4, kind: input, shape index: {}]   ;;  %s1721_s5 = inlined_call_operand.hbm [shape: f32[128,128], index: 5, kind: input, shape index: {}]   ;;  %s1722_s6 = inlined_call_operand.hbm [shape: f32[64,128], index: 6, kind: output, shape index: {}]  }
   0x1   :  { %13 = vsyncpa [#allocation3 + $0x1], 0 }
   0x2   :  { %14 = vsyncpa [#allocation6], 0 }
   0x3   :  { %15 = vsyncpa [#allocation9], 0 }
   0x4   :  { %16 = vsyncpa [#allocation4], 0 }
   0x5   :  { %18 = vsyncpa [#allocation4 + $0x1], 0  ;;  %s1449_s21 = smov 0   ;;  %s1451_s22 = smov 0  }
   0x6   :  { %s1453_s23 = smov 0   ;;  %s1455_s24 = smov 0  }
   0x7 LB: > { %s1470_s25 = sadd.s32 4294967295, %s1400_s24   ;;  %s917_s26 = sadd.s32 4294967294, %s1400_s24   ;;  %s1400_s24 = sphi %s1455_s24, %s1749_s24   ;;  %s1396_s23 = sphi %s1453_s23, %s1748_s23   ;;  %s1392_s22 = sphi %s1451_s22, %s1747_s22   ;;  %s1388_s21 = sphi %s1449_s21, %s1746_s21  }
   0x8   : > { %p44_p0 = scmp.ne.s32.totalorder %s1392_s22, %s1388_s21  ;;  %p1723_p1 = scmp.eq.s32.totalorder %s1470_s25, 0 }
   0x9   : > { %p173_p2 = scmp.eq.s32.totalorder %s1470_s25, 1  ;;  %p179_p3 = scmp.eq.s32.totalorder %s917_s26, 1 }
   0xa   : > { %p1479_p4 = por %p1723_p1, %p44_p0  ;;  %p918_p5 = scmp.ge.s32.totalorder %s1400_s24, 1 }
   0xb   : > { %p1484_p6 = por %p179_p3, %p44_p0  ;;  %p186_p7 = scmp.lt.s32.totalorder %s1400_s24, 3 }
   0xc   : > { %s1729_s27 = scalar_select %p1479_p4, 1, 0 }
   0xd   : > { %s1730_s28 = scalar_select %p1484_p6, 1, 0 }
   0xe   : > { %p1489_p8 = pnand %p918_p5, %p186_p7  ;;  %s1402_s30 = smov [#allocation5]  }
   0xf   : > { %s198_s7 = sshll.u32 %s1402_s30, 4  ;;  %s1403_s9 = smov [#allocation7]   ;;  %s199_s7 = int_to_ptr.vmem [resolvable:$true] %s198_s7 }
  0x10   : > { %s1731_s29 = scalar_select %p1489_p8, 1, 0 }
  0x11   : > { %p1106_p9 = pneg %p1489_p8  ;;  %s214_s10 = sshll.u32 %s1403_s9, 4  ;;  %s215_s10 = int_to_ptr.vmem [resolvable:$true] %s214_s10 }
  0x12   : > { %s1233_s11 = scalar_lea.vmem %s199_s7, 2048  ;;  %p1241_p5 = scmp.lt.s32.totalorder %s199_s7, %s199_s7 }
  0x13   : > { %p1498_p11 = pnand %p1106_p9, %p1723_p1  ;;  %p1234_p13 = scmp.ne.s32.totalorder %s199_s7, %s1233_s11 }
  0x14   : > { %p1242_p7 = scmp.lt.s32.totalorder %s1233_s11, %s1233_s11 }
  0x15   : > { %p1224_p12 = pneg %p1498_p11 }
  0x16   : > { %p1243_p10 = por %p1242_p7, %p1241_p5 }
  0x17   : > { %p1236_p0 = pnand %p1234_p13, %p1224_p12 }
  0x19   : > { %p1237_p3 = pneg %p1236_p0 }
  0x1b   : > { %p1244_p9 = pnand %p1243_p10, %p1237_p3 }
  0x1d   : > { %1247 = shalt.err (!%p1244_p9)
}
  0x1e   : > { %s1724_s12 = smov 128   ;;  %s1725_s13 = smov 8  }
  0x1f   : > { %1109 = dma.hbm_to_vmem [thread:$0]  (!%p1498_p11), %s1717_s1, 2048, %s199_s7, [#allocation6], %s1724_s12, %s1724_s12, %s1725_s13  }
  0x20   : > { %s1259_s16 = scalar_lea.vmem %s215_s10, 2048  ;;  %p1267_p10 = scmp.lt.s32.totalorder %s215_s10, %s215_s10 }
  0x21   : > { %p1260_p13 = scmp.ne.s32.totalorder %s215_s10, %s1259_s16  ;;  %p1268_p3 = scmp.lt.s32.totalorder %s1259_s16, %s1259_s16 }
  0x23   : > { %p1262_p0 = pnand %p1260_p13, %p1224_p12  ;;  %p1269_p7 = por %p1268_p3, %p1267_p10 }
  0x25   : > { %p1263_p5 = pneg %p1262_p0 }
  0x27   : > { %p1270_p9 = pnand %p1269_p7, %p1263_p5 }
  0x29   : > { %1273 = shalt.err (!%p1270_p9)
}
  0x2a   : > { %s1406_s17 = smov 64   ;;  %s1407_s18 = smov 4  }
  0x2b   : > { %1112 = dma.hbm_to_vmem [thread:$0]  (!%p1498_p11), %s1719_s3, 2048, %s215_s10, [#allocation6], %s1406_s17, %s1406_s17, %s1407_s18  }
  0x2c   : > { %s1408_s26 = smov [#allocation8]   ;;  %s1524_s7 = sadd.s32 1, %s1400_s24  }
  0x2d   : > { %s230_s30 = sshll.u32 %s1408_s26, 4  ;;  %s231_s30 = int_to_ptr.vmem [resolvable:$true] %s230_s30 }
  0x2e   : > { %s1285_s9 = scalar_lea.vmem %s231_s30, 2048  ;;  %p1293_p10 = scmp.lt.s32.totalorder %s231_s30, %s231_s30 }
  0x2f   : > { %p1286_p13 = scmp.ne.s32.totalorder %s231_s30, %s1285_s9  ;;  %p1294_p3 = scmp.lt.s32.totalorder %s1285_s9, %s1285_s9 }
  0x31   : > { %p1288_p0 = pnand %p1286_p13, %p1224_p12  ;;  %p1295_p7 = por %p1294_p3, %p1293_p10 }
  0x33   : > { %p1289_p5 = pneg %p1288_p0 }
  0x35   : > { %p1296_p9 = pnand %p1295_p7, %p1289_p5 }
  0x37   : > { %1299 = shalt.err (!%p1296_p9)
}
  0x38   : > { %1115 = dma.hbm_to_vmem [thread:$0]  (!%p1498_p11), %s1721_s5, 2048, %s231_s30, [#allocation9], %s1724_s12, %s1724_s12, %s1725_s13  }
  0x39   : > { %s28_s14 = ssub.s32 %s1400_s24, %s1524_s7  ;;  %s31_s8 = sadd.s32 1, %s1396_s23 }
  0x3a   : > { %p29_p12 = scmp.eq.s32.totalorder %s28_s14, 0  ;;  %p38_p13 = scmp.ne.s32.totalorder %s1396_s23, %s1392_s22 }
  0x3b   : > { %p39_p0 = scmp.eq.s32.totalorder %s1400_s24, 0  ;;  %p1127_p5 = scmp.lt.s32.totalorder %s1400_s24, 2 }
  0x3c   : > { %s1545_s15 = scalar_select %p29_p12, %s1396_s23, %s31_s8  }
  0x3d   : > { %p40_p10 = por %p39_p0, %p38_p13  ;;  %p1549_p3 = por %p173_p2, %p38_p13 }
  0x3e   : > { %s244_s17 = sand.u32 1, %s1396_s23   ;;  %s970_s18 = sshll.u32 %s1400_s24, 9 }
  0x3f   : > { %s1733_s16 = scalar_select %p1549_p3, 1, 0 }
  0x40   : > { %s923_s19 = sshll.u32 %s244_s17, 5  ;;  %s1558_s30 = scalar_lea.hbm %s1716_s0, %s970_s18 }
  0x41   : > { %s248_s9 = scalar_lea.vmem [#allocation2], %s923_s19  ;;  %p1560_p11 = pnand %p1127_p5, %p40_p10 }
  0x42   : > { %s255_s10 = sshll.u32 %s248_s9, 4  ;;  %s1566_s14 = scalar_lea.sflag [#allocation3], %s244_s17  ;;  %s1564_s10 = int_to_ptr.vmem [resolvable:$true] %s255_s10 }
  0x43   : > { %s1300_s8 = scalar_lea.hbm %s1558_s30, 512  ;;  %p1302_p7 = pneg %p1560_p11 }
  0x44   : > { %p1301_p2 = scmp.ne.s32.totalorder %s1558_s30, %s1300_s8  ;;  %s1305_s19 = scalar_lea.hbm %s1716_s0, 1024 }
  0x45   : > { %p1306_p13 = scmp.lt.s32.totalorder %s1558_s30, %s1716_s0  ;;  %p1307_p0 = scmp.lt.s32.totalorder %s1305_s19, %s1300_s8 }
  0x46   : > { %p1303_p9 = pnand %p1302_p7, %p1301_p2 }
  0x47   : > { %p1308_p5 = por %p1307_p0, %p1306_p13 }
  0x48   : > { %p1304_p12 = pneg %p1303_p9 }
  0x4a   : > { %p1309_p10 = pnand %p1308_p5, %p1304_p12 }
  0x4c   : > { %1312 = shalt.err (!%p1309_p10)
}
  0x4d   : > { %s1313_s17 = scalar_lea.vmem %s1564_s10, 512  ;;  %s1409_s12 = smov [#allocation2]  }
  0x4e   : > { %p1314_p1 = scmp.ne.s32.totalorder %s1564_s10, %s1313_s17  ;;  %s1318_s13 = sshll.u32 %s1409_s12, 4  ;;  %s1319_s13 = int_to_ptr.vmem [resolvable:$false] %s1318_s13 }
  0x4f   : > { %s1320_s18 = scalar_lea.vmem %s1319_s13, 1024  ;;  %p1321_p9 = scmp.lt.s32.totalorder %s1564_s10, %s1319_s13 }
  0x50   : > { %p1316_p6 = pnand %p1314_p1, %p1302_p7  ;;  %p1322_p3 = scmp.lt.s32.totalorder %s1320_s18, %s1313_s17 }
  0x52   : > { %p1317_p2 = pneg %p1316_p6  ;;  %p1323_p4 = por %p1322_p3, %p1321_p9 }
  0x54   : > { %p1324_p8 = pnand %p1323_p4, %p1317_p2 }
  0x56   : > { %1327 = shalt.err (!%p1324_p8)
}
  0x57   : > { %s1735_s8 = smov 8   ;;  %s1736_s20 = smov 128  }
  0x58   : > { %1119 = dma.hbm_to_vmem [thread:$0]  (!%p1560_p11), %s1558_s30, 512, %s1564_s10, %s1566_s14, %s1736_s20, %s1736_s20, %s1735_s8  }
  0x59   : > { %p1737_p1 = scmp.ne.s32.totalorder %s1731_s29, 0 }
  0x5a   : > { %s1593_s12 = sand.u32 (!%p1737_p1), 1, %s1392_s22   ;;  %p1738_p4 = scmp.ne.s32.totalorder (!%p1737_p1), %s1729_s27, 0 }
  0x5b   : > { %267 = sbr.rel (%p1737_p1) target bundleno = 782 (0x30e), region = 44  ;;  %s927_s13 = sshll.u32 (!%p1737_p1), %s1593_s12, 5 }
  0x5c   : > { %s270_s19 = scalar_lea.sflag (!%p1737_p1), [#allocation3], %s1593_s12  ;;  %s1599_s11 = scalar_lea.vmem (!%p1737_p1), [#allocation2], %s927_s13 }
  0x60   : > { %1371 = dma.done.wait (%p1738_p4), %s270_s19, 512  }
  0x61   : > { %1373 = vsyncadd (%p1738_p4), %s270_s19, 4294966784  ;;  %p1739_p6 = scmp.eq.s32.totalorder %s1470_s25, 0 }
  0x63   : > { %1375 = dma.done.wait (%p1739_p6), [#allocation6], 4096   ;;  %p1740_p8 = pmov %p1739_p6 }
  0x64   : > { %p1741_p3 = pmov %p1739_p6 }
  0x65   : > { %1377 = vsyncadd (%p1740_p8), [#allocation6], 4294963200 }
  0x66   : > { %1379 = dma.done.wait (%p1741_p3), [#allocation9], 2048   ;;  %p1742_p11 = pmov %p1741_p3 }
  0x67   : > { %v1410_v0 = vmov 0   ;;  %v1174_v1 = vld [vmem:[#allocation5 + $0x74] ss:$8 sps:$4 sm:$0xff]   ;;  %v1176_v2 = vld [vmem:[#allocation5 + $0x70] ss:$8 sps:$4 sm:$0xff]   ;;  %v1202_v16 = vld [vmem:[#allocation7 + $0x68] sm:$0xff]   ;;  %v341_v49 = vlaneseq }
  0x68   : > { %1381 = vsyncadd (%p1742_p11), [#allocation9], 4294965248  ;;  %463 = vmatprep.mubr.bf16.mxu0 %v1410_v0  ;;  %431 = vmatprep.subr.bf16.mxu0 %v1174_v1  ;;  %v1177_v3 = vld [vmem:[#allocation5 + $0x64] ss:$8 sps:$4 sm:$0xff]   ;;  %v1179_v4 = vld [vmem:[#allocation5 + $0x60] ss:$8 sps:$4 sm:$0xff]  }
  0x69   : > { %432 = vmatpush1.bf16.msra.mxu0 %v1176_v2  ;;  %v1180_v5 = vld [vmem:[#allocation5 + $0x54] ss:$8 sps:$4 sm:$0xff]   ;;  %v1182_v6 = vld [vmem:[#allocation5 + $0x50] ss:$8 sps:$4 sm:$0xff]   ;;  %v1183_v7 = vld [vmem:[#allocation5 + $0x44] ss:$8 sps:$4 sm:$0xff]  }
  0x6a   : > { %433 = vmatprep.subr.bf16.mxu0 %v1177_v3  ;;  %v1185_v8 = vld [vmem:[#allocation5 + $0x40] ss:$8 sps:$4 sm:$0xff]   ;;  %v1186_v9 = vld [vmem:[#allocation5 + $0x34] ss:$8 sps:$4 sm:$0xff]   ;;  %v1188_v11 = vld [vmem:[#allocation5 + $0x30] ss:$8 sps:$4 sm:$0xff]  }
  0x6b   : > { %v1198_v10 = vld [vmem:[#allocation7 + $0x78] sm:$0xff]   ;;  %v1189_v13 = vld [vmem:[#allocation5 + $0x24] ss:$8 sps:$4 sm:$0xff]   ;;  %v1200_v14 = vld [vmem:[#allocation7 + $0x70] sm:$0xff]   ;;  %v342_v50 = vshrl.u32 %v341_v49, 7  ;;  %s313_s14 = scalar_lea.vmem [#allocation10], %s927_s13 }
  0x6c   : > { %v1199_v12 = vld [vmem:[#allocation7 + $0x38] sm:$0xff]   ;;  %972 = vmatprep.subr.bf16.mxu1 %v1198_v10  ;;  %v1201_v15 = vld [vmem:[#allocation7 + $0x30] sm:$0xff]   ;;  %v1191_v17 = vld [vmem:[#allocation5 + $0x20] ss:$8 sps:$4 sm:$0xff]   ;;  %s971_s26 = sshll.u32 %s1470_s25, 9  ;;  %s815_s9 = sshll.u32 %s313_s14, 4  ;;  %s1673_s9 = int_to_ptr.vmem [resolvable:$true] %s815_s9 }
  0x6d   : > { %434 = vmatpush1.bf16.msra.mxu0 %v1179_v4  ;;  %973 = vmatpush3.bf16.msra.mxu1 %v1199_v12  ;;  %v1192_v18 = vld [vmem:[#allocation5 + $0x14] ss:$8 sps:$4 sm:$0xff]   ;;  %v1203_v19 = vld [vmem:[#allocation7 + $0x28] sm:$0xff]   ;;  %v1204_v20 = vld [vmem:[#allocation7 + $0x60] sm:$0xff]   ;;  %v347_v51 = vsub.s32 1, %v342_v50  ;;  %v343_v52 = vsub.s32 0, %v342_v50  ;;  %s1671_s8 = scalar_lea.hbm %s1722_s6, %s971_s26 }
  0x6e   : > { %435 = vmatprep.subr.bf16.mxu0 %v1180_v5  ;;  %974 = vmatprep.subr.bf16.mxu1 %v1200_v14  ;;  %v1194_v21 = vld [vmem:[#allocation5 + $0x10] ss:$8 sps:$4 sm:$0xff]   ;;  %v1205_v22 = vld [vmem:[#allocation7 + $0x20] sm:$0xff]   ;;  %v318_v27 = vld [vmem:[%s1599_s11 + $0x8] sm:$0xff]  ;;  %s802_s20 = scalar_lea.sflag [#allocation4], %s1593_s12  ;;  %s1328_s13 = scalar_lea.vmem %s1673_s9, 512 }
  0x6f   : > { %v1195_v23 = vld [vmem:[#allocation5 + $0x4] ss:$8 sps:$4 sm:$0xff]   ;;  %v1206_v24 = vld [vmem:[#allocation7 + $0x58] sm:$0xff]   ;;  %v1197_v25 = vld [vmem:[#allocation5] ss:$8 sps:$4 sm:$0xff]   ;;  %p1329_p7 = scmp.ne.s32.totalorder %s1673_s9, %s1328_s13  ;;  %p1743_p12 = scmp.ne.s32.totalorder %s1733_s16, 0 }
  0x70   : > { %v317_v26 = vld [vmem:[%s1599_s11] sm:$0xff]  ;;  %v1207_v28 = vld [vmem:[#allocation7 + $0x18] sm:$0xff]   ;;  %v319_v30 = vld [vmem:[%s1599_s11 + $0x10] sm:$0xff]  ;;  %s1411_s25 = smov [#allocation10]  }
  0x71   : > { %436 = vmatpush1.bf16.msra.mxu0 %v1182_v6  ;;  %975 = vmatpush3.bf16.msra.mxu1 %v1201_v15  ;;  %v321_v29 = vpack.c.bf16 %v318_v27, %v317_v26  ;;  %v320_v31 = vld [vmem:[%s1599_s11 + $0x18] sm:$0xff]  ;;  %v1208_v33 = vld [vmem:[#allocation7 + $0x50] sm:$0xff]   ;;  %v1210_v35 = vld [vmem:[#allocation7 + $0x48] sm:$0xff]   ;;  %p1330_p13 = pnand %p1329_p7, %p1743_p12  ;;  %s1332_s19 = sshll.u32 %s1411_s25, 4  ;;  %s1333_s19 = int_to_ptr.vmem [resolvable:$false] %s1332_s19 }
  0x72   : > { %437 = vmatprep.subr.bf16.mxu0 %v1183_v7  ;;  %976 = vmatprep.subr.bf16.mxu1 %v1202_v16  ;;  %v322_v32 = vpack.c.bf16 %v320_v31, %v319_v30  ;;  %v1209_v34 = vld [vmem:[#allocation7 + $0x10] sm:$0xff]   ;;  %v1211_v36 = vld [vmem:[#allocation7 + $0x8] sm:$0xff]   ;;  %v1212_v37 = vld [vmem:[#allocation7 + $0x40] sm:$0xff]   ;;  %s1334_s11 = scalar_lea.vmem %s1333_s19, 1024  ;;  %p1335_p5 = scmp.lt.s32.totalorder %s1673_s9, %s1333_s19 }
  0x73   : > { %v1213_v38 = vld [vmem:[#allocation7] sm:$0xff]   ;;  %v699_v39 = vld [vmem:[#allocation8 + $0x78] sm:$0xff]  ;;  %v1617_v40 = vld [vmem:[#allocation8 + $0x70] sm:$0xff]  ;;  %p1331_p0 = pneg %p1330_p13  ;;  %p1336_p10 = scmp.lt.s32.totalorder %s1334_s11, %s1328_s13 }
  0x74   : > { %v1619_v41 = vld [vmem:[#allocation8 + $0x68] sm:$0xff]  ;;  %v1623_v42 = vld [vmem:[#allocation8 + $0x60] sm:$0xff]  ;;  %v1627_v43 = vld [vmem:[#allocation8 + $0x58] sm:$0xff] }
  0x75   : > { %438 = vmatpush1.bf16.msra.mxu0 %v1185_v8  ;;  %977 = vmatpush3.bf16.msra.mxu1 %v1203_v19  ;;  %v1631_v44 = vld [vmem:[#allocation8 + $0x50] sm:$0xff]  ;;  %v1635_v45 = vld [vmem:[#allocation8 + $0x48] sm:$0xff]  ;;  %v1639_v46 = vld [vmem:[#allocation8 + $0x40] sm:$0xff]  ;;  %p1337_p2 = por %p1336_p10, %p1335_p5 }
  0x76   : > { %439 = vmatprep.subr.bf16.mxu0 %v1186_v9  ;;  %978 = vmatprep.subr.bf16.mxu1 %v1204_v20  ;;  %v691_v47 = vld [vmem:[#allocation8 + $0x38] sm:$0xff]  ;;  %v690_v48 = vld [vmem:[#allocation8 + $0x30] sm:$0xff]  ;;  %v339_v53 = vld [vmem:[%s1718_s2] sm:$0x3] }
  0x77   : > { %v348_v55 = vrot.slane %v339_v53, %v347_v51  ;;  %v344_v56 = vrot.slane %v339_v53, %v343_v52  ;;  %v689_v20 = vld [vmem:[#allocation8 + $0x28] sm:$0xff]  ;;  %v948_v27 = vld [vmem:[%s1720_s4] ss:$0 sm:$0xff]  ;;  %p1338_p9 = pnand %p1337_p2, %p1331_p0 }
  0x79   : > { %440 = vmatpush1.bf16.msra.mxu0 %v1188_v11  ;;  %979 = vmatpush3.bf16.msra.mxu1 %v1205_v22  ;;  %v687_v22 = vld [vmem:[#allocation8 + $0x18] sm:$0xff] }
  0x7a   : > { %441 = vmatprep.subr.bf16.mxu0 %v1189_v13  ;;  %980 = vmatprep.subr.bf16.mxu1 %v1206_v24  ;;  %v685_v24 = vld [vmem:[#allocation8 + $0x8] sm:$0xff] }
  0x7d   : > { %442 = vmatpush1.bf16.msra.mxu0 %v1191_v17  ;;  %981 = vmatpush3.bf16.msra.mxu1 %v1207_v28 }
  0x7e   : > { %443 = vmatprep.subr.bf16.mxu0 %v1192_v18  ;;  %982 = vmatprep.subr.bf16.mxu1 %v1208_v33 }
  0x81   : > { %444 = vmatpush1.bf16.msra.mxu0 %v1194_v21  ;;  %983 = vmatpush3.bf16.msra.mxu1 %v1209_v34  ;;  %v688_v21 = vld [vmem:[#allocation8 + $0x20] sm:$0xff] }
  0x82   : > { %445 = vmatprep.subr.bf16.mxu0 %v1195_v23  ;;  %984 = vmatprep.subr.bf16.mxu1 %v1210_v35  ;;  %v686_v23 = vld [vmem:[#allocation8 + $0x10] sm:$0xff] }
  0x85   : > { %446 = vmatpush1.bf16.msra.mxu0 %v1197_v25  ;;  %985 = vmatpush3.bf16.msra.mxu1 %v1211_v36  ;;  %v684_v25 = vld [vmem:[#allocation8] sm:$0xff] }
  0x86   : > { %986 = vmatprep.subr.bf16.mxu1 %v1212_v37  ;;  %1020 = vmatprep.subr.mxu0 %v699_v39 }
  0x88   : > { %464 = vmatmul.mubr.bf16.vlgmr.msra.gmra.mxu0 %v321_v29 }
  0x89   : > { %473 = vmatprep.mubr.bf16.mxu0 %v1410_v0  ;;  %987 = vmatpush3.bf16.msra.mxu1 %v1213_v38 }
  0x8a   : > { %1058 = vmatprep.subr.mxu1 %v699_v39  ;;  %1021 = vmatpush3.msra.mxu0 %v699_v39 }
  0x8b   : > { %1022 = vmatprep.subr.mxu0 %v1617_v40 }
  0x8c   : > { %1023 = vmatpush3.msra.mxu0 %v1617_v40 }
  0x8d   : > { %1024 = vmatprep.subr.mxu0 %v1619_v41 }
  0x8e   : > { %1025 = vmatpush3.msra.mxu0 %v1619_v41 }
  0x8f   : > { %1026 = vmatprep.subr.mxu0 %v1623_v42 }
  0x90   : > { %474 = vmatmul.mubr.bf16.gmra.mxu0 %v322_v32 }
  0x91   : > { %1027 = vmatpush3.msra.mxu0 %v1623_v42 }
  0x92   : > { %1028 = vmatprep.subr.mxu0 %v1627_v43 }
  0x93   : > { %1029 = vmatpush3.msra.mxu0 %v1627_v43 }
  0x94   : > { %1030 = vmatprep.subr.mxu0 %v1631_v44 }
  0x95   : > { %1031 = vmatpush3.msra.mxu0 %v1631_v44 }
  0x96   : > { %1032 = vmatprep.subr.mxu0 %v1635_v45 }
  0x97   : > { %1033 = vmatpush3.msra.mxu0 %v1635_v45 }
  0x98   : > { %1034 = vmatprep.subr.mxu0 %v1639_v46 }
  0x99   : > { %1035 = vmatpush3.msra.mxu0 %v1639_v46 }
  0x9a   : > { %1036 = vmatprep.subr.mxu0 %v691_v47 }
  0x9b   : > { %1037 = vmatpush3.msra.mxu0 %v691_v47 }
  0x9c   : > { %1038 = vmatprep.subr.mxu0 %v690_v48 }
  0x9d   : > { %1039 = vmatpush3.msra.mxu0 %v690_v48 }
  0x9e   : > { %1040 = vmatprep.subr.mxu0 %v689_v20 }
  0x9f   : > { %1041 = vmatpush3.msra.mxu0 %v689_v20 }
  0xa0   : > { %1042 = vmatprep.subr.mxu0 %v688_v21 }
  0xa1   : > { %1043 = vmatpush3.msra.mxu0 %v688_v21 }
  0xa2   : > { %1044 = vmatprep.subr.mxu0 %v687_v22 }
  0xa3   : > { %1045 = vmatpush3.msra.mxu0 %v687_v22 }
  0xa4   : > { %1046 = vmatprep.subr.mxu0 %v686_v23 }
  0xa5   : > { %1047 = vmatpush3.msra.mxu0 %v686_v23 }
  0xa6   : > { %1048 = vmatprep.subr.mxu0 %v685_v24 }
  0xa7   : > { %1049 = vmatpush3.msra.mxu0 %v685_v24 }
  0xa8   : > { %1050 = vmatprep.subr.mxu0 %v684_v25 }
  0xa9   : > { %1051 = vmatpush3.msra.mxu0 %v684_v25 }
 0x148   : > { %v465_v54 = vpop.f32.mrf.mxu0 }
 0x149   : > { %v466_v61 = vadd.f32 %v465_v54, %v344_v56 }
 0x14a   : > { %v467_v57 = vpop.f32.mrf.mxu0 }
 0x14b   : > { %v468_v59 = vadd.f32 %v467_v57, %v348_v55  ;;  %v484_v4 = vmax.f32 %v466_v61, 0.0 }
 0x14c   : > { %v469_v58 = vpop.f32.mrf.mxu0 }
 0x14d   : > { %v470_v60 = vadd.f32 %v469_v58, %v344_v56  ;;  %v485_v2 = vmax.f32 %v468_v59, 0.0 }
 0x14e   : > { %v471_v62 = vpop.f32.mrf.mxu0 }
 0x14f   : > { %v472_v63 = vadd.f32 %v471_v62, %v348_v55  ;;  %v486_v0 = vmax.f32 %v470_v60, 0.0 }
 0x150   : > { %v475_v1 = vpop.f32.mrf.mxu0 }
 0x151   : > { %v487_v3 = vmax.f32 %v472_v63, 0.0  ;;  %v492_v7 = vpack.c.bf16 %v486_v0, %v484_v4  ;;  %v476_v11 = vadd.f32 %v475_v1, %v344_v56 }
 0x152   : > { %v477_v5 = vpop.f32.mrf.mxu0 }
 0x153   : > { %v493_v6 = vpack.c.bf16 %v487_v3, %v485_v2  ;;  %v478_v9 = vadd.f32 %v477_v5, %v348_v55  ;;  %v488_v17 = vmax.f32 %v476_v11, 0.0 }
 0x154   : > { %v479_v8 = vpop.f32.mrf.mxu0 }
 0x155   : > { %v480_v10 = vadd.f32 %v479_v8, %v344_v56  ;;  %663 = vmatprep.mubr.bf16.mxu1 %v493_v6  ;;  %v489_v15 = vmax.f32 %v478_v9, 0.0 }
 0x156   : > { %v481_v12 = vpop.f32.mrf.mxu0  ;;  %664 = vmatmul.mubr.bf16.vlgmr.msra.gmra.mxu1 %v492_v7 }
 0x157   : > { %v482_v13 = vadd.f32 %v481_v12, %v348_v55  ;;  %1074 = vmatpush3.msra.mxu1 %v699_v39  ;;  %v490_v14 = vmax.f32 %v480_v10, 0.0 }
 0x158   : > { %1059 = vmatprep.subr.mxu1 %v1617_v40 }
 0x159   : > { %v491_v16 = vmax.f32 %v482_v13, 0.0  ;;  %1075 = vmatpush3.msra.mxu1 %v1617_v40  ;;  %v494_v19 = vpack.c.bf16 %v490_v14, %v488_v17 }
 0x15a   : > { %1060 = vmatprep.subr.mxu1 %v1619_v41 }
 0x15b   : > { %v495_v18 = vpack.c.bf16 %v491_v16, %v489_v15  ;;  %1076 = vmatpush3.msra.mxu1 %v1619_v41 }
 0x15c   : > { %1061 = vmatprep.subr.mxu1 %v1623_v42 }
 0x15d   : > { %671 = vmatprep.mubr.bf16.mxu1 %v495_v18  ;;  %1077 = vmatpush3.msra.mxu1 %v1623_v42 }
 0x15e   : > { %672 = vmatmul.mubr.bf16.gmra.mxu1 %v494_v19  ;;  %1062 = vmatprep.subr.mxu1 %v1627_v43 }
 0x15f   : > { %1078 = vmatpush3.msra.mxu1 %v1627_v43 }
 0x160   : > { %1063 = vmatprep.subr.mxu1 %v1631_v44 }
 0x161   : > { %1079 = vmatpush3.msra.mxu1 %v1631_v44 }
 0x162   : > { %1064 = vmatprep.subr.mxu1 %v1635_v45 }
 0x163   : > { %1080 = vmatpush3.msra.mxu1 %v1635_v45 }
 0x164   : > { %1065 = vmatprep.subr.mxu1 %v1639_v46 }
 0x165   : > { %1081 = vmatpush3.msra.mxu1 %v1639_v46 }
 0x166   : > { %1066 = vmatprep.subr.mxu1 %v691_v47 }
 0x167   : > { %1082 = vmatpush3.msra.mxu1 %v691_v47 }
 0x168   : > { %1067 = vmatprep.subr.mxu1 %v690_v48 }
 0x169   : > { %1083 = vmatpush3.msra.mxu1 %v690_v48 }
 0x16a   : > { %1068 = vmatprep.subr.mxu1 %v689_v20 }
 0x16b   : > { %1084 = vmatpush3.msra.mxu1 %v689_v20 }
 0x16c   : > { %1069 = vmatprep.subr.mxu1 %v688_v21 }
 0x16d   : > { %1085 = vmatpush3.msra.mxu1 %v688_v21 }
 0x16e   : > { %1070 = vmatprep.subr.mxu1 %v687_v22 }
 0x16f   : > { %1086 = vmatpush3.msra.mxu1 %v687_v22 }
 0x170   : > { %1071 = vmatprep.subr.mxu1 %v686_v23 }
 0x171   : > { %1087 = vmatpush3.msra.mxu1 %v686_v23 }
 0x172   : > { %1072 = vmatprep.subr.mxu1 %v685_v24 }
 0x173   : > { %1088 = vmatpush3.msra.mxu1 %v685_v24 }
 0x174   : > { %1073 = vmatprep.subr.mxu1 %v684_v25 }
 0x175   : > { %1089 = vmatpush3.msra.mxu1 %v684_v25 }
 0x216   : > { %v988_v26 = vpop.f32.mrf.mxu1 }
 0x218   : > { %v989_v28 = vpop.f32.mrf.mxu1 }
 0x219   : > { %v990_v29 = vadd.f32 %v989_v28, %v988_v26 }
 0x21a   : > { %v991_v30 = vpop.f32.mrf.mxu1 }
 0x21b   : > { %v666_v31 = vadd.f32 %v990_v29, %v948_v27 }
 0x21c   : > { %v992_v32 = vpop.f32.mrf.mxu1 }
 0x21d   : > { %v993_v33 = vadd.f32 %v992_v32, %v991_v30  ;;  %v680_v34 = vmul.f32 %v666_v31, %v666_v31 }
 0x21e   : > { %v994_v35 = vpop.f32.mrf.mxu1 }
 0x21f   : > { %v669_v36 = vadd.f32 %v993_v33, %v948_v27  ;;  %1052 = vmatprep.mubr.f32.mxu0 %v680_v34 }
 0x220   : > { %v995_v37 = vpop.f32.mrf.mxu1 }
 0x221   : > { %v681_v38 = vmul.f32 %v669_v36, %v669_v36  ;;  %v996_v39 = vadd.f32 %v995_v37, %v994_v35 }
 0x222   : > { %v997_v40 = vpop.f32.mrf.mxu1 }
 0x223   : > { %v674_v41 = vadd.f32 %v996_v39, %v948_v27  ;;  %1053 = vmatmul.mubr.f32.vlgmr.msra.gmra.mxu0 %v681_v38 }
 0x224   : > { %v998_v42 = vpop.f32.mrf.mxu1 }
 0x225   : > { %v999_v43 = vadd.f32 %v998_v42, %v997_v40  ;;  %v682_v44 = vmul.f32 %v674_v41, %v674_v41 }
 0x227   : > { %v677_v45 = vadd.f32 %v999_v43, %v948_v27  ;;  %1055 = vmatprep.mubr.f32.mxu1 %v682_v44 }
 0x229   : > { %v683_v46 = vmul.f32 %v677_v45, %v677_v45 }
 0x22b   : > { %1056 = vmatmul.mubr.f32.vlgmr.msra.gmra.mxu1 %v683_v46 }
 0x2e3   : > { %v1054_v47 = vpop.f32.mrf.mxu0 }
 0x2e4   : > { %v786_v48 = vmax.f32 %v1054_v47, 1e-24 }
 0x2e5   : > { %v766_v49 = vpop.f32.mrf.mxu0 }
 0x2e6   : > { %1214 = vrsqrt.f32 %v786_v48  ;;  %v785_v50 = vmax.f32 %v766_v49, 1e-24 }
 0x2e8   : > { %1216 = vrsqrt.f32 %v785_v50 }
 0x2eb   : > { %v1057_v51 = vpop.f32.mrf.mxu1 }
 0x2ec   : > { %v788_v52 = vmax.f32 %v1057_v51, 1e-24 }
 0x2ed   : > { %v776_v53 = vpop.f32.mrf.mxu1 }
 0x2ee   : > { %1218 = vrsqrt.f32 %v788_v52  ;;  %v787_v54 = vmax.f32 %v776_v53, 1e-24 }
 0x2f0   : > { %1220 = vrsqrt.f32 %v787_v54 }
 0x2f3   : > { %v1215_v55 = vpop.eup %1214 }
 0x2f4   : > { %v794_v56 = vmul.f32 %v1215_v55, %v669_v36 }
 0x2f5   : > { %v1217_v57 = vpop.eup %1216 }
 0x2f6   : > { %798 = vst [vmem:[%s313_s14 + $0x8] sm:$0xff] %v794_v56  ;;  %v793_v58 = vmul.f32 %v1217_v57, %v666_v31 }
 0x2f8   : > { %797 = vst [vmem:[%s313_s14] sm:$0xff] %v793_v58 }
 0x2fb   : > { %v1219_v59 = vpop.eup %1218 }
 0x2fc   : > { %v796_v60 = vmul.f32 %v1219_v59, %v677_v45 }
 0x2fd   : > { %v1221_v61 = vpop.eup %1220 }
 0x2fe   : > { %800 = vst [vmem:[%s313_s14 + $0x18] sm:$0xff] %v796_v60  ;;  %v795_v62 = vmul.f32 %v1221_v61, %v674_v41 }
 0x300   : > { %799 = vst [vmem:[%s313_s14 + $0x10] sm:$0xff] %v795_v62 }
 0x301   : > { %1341 = shalt.err (!%p1338_p9)
}
 0x302   : > { %s1342_s27 = scalar_lea.hbm %s1671_s8, 512  ;;  %s1346_s10 = scalar_lea.hbm %s1722_s6, 1024 }
 0x303   : > { %p1343_p1 = scmp.ne.s32.totalorder %s1671_s8, %s1342_s27  ;;  %p1347_p8 = scmp.lt.s32.totalorder %s1671_s8, %s1722_s6 }
 0x304   : > { %p1348_p3 = scmp.lt.s32.totalorder %s1346_s10, %s1342_s27 }
 0x305   : > { %p1344_p4 = pnand %p1343_p1, %p1743_p12 }
 0x306   : > { %p1349_p11 = por %p1348_p3, %p1347_p8 }
 0x307   : > { %p1345_p6 = pneg %p1344_p4 }
 0x309   : > { %p1350_p7 = pnand %p1349_p11, %p1345_p6 }
 0x30b   : > { %1353 = shalt.err (!%p1350_p7)
}
 0x30c   : > { %s1412_s17 = smov 128   ;;  %s1413_s18 = smov 8  }
 0x30d   : > { %1104 = dma.vmem_to_hbm [thread:$0]  (%p1743_p12), %s1673_s9, 512, %s1671_s8, %s802_s20, %s1412_s17, %s1412_s17, %s1413_s18  }
 0x30e PF: > { %s830_s13 = sand.u32 1, %s1388_s21   ;;  %p1744_p13 = scmp.ne.s32.totalorder %s1730_s28, 0 }
 0x30f   : > { %p1745_p0 = scmp.ge.s32.totalorder %s1400_s24, 2  ;;  %s831_s25 = scalar_lea.sflag [#allocation4], %s830_s13 }
 0x311   : > { %p1121_p5 = pnand %p1745_p0, %p1744_p13 }
 0x313   : > { %p1122_p10 = pneg %p1121_p5 }
 0x315   : > { %1383 = dma.done.wait (%p1122_p10), %s831_s25, 512  }
 0x316   : > { %1385 = vsyncadd (%p1122_p10), %s831_s25, 4294966784  ;;  %p21_p2 = scmp.ge.s32.totalorder %s1524_s7, 4   ;;  %s1746_s21 = smov %s1392_s22 }
 0x317   : > { %s1747_s22 = smov %s1396_s23  ;;  %s1748_s23 = smov %s1545_s15 }
 0x318   : > { %s1749_s24 = smov %s1524_s7  ;;  %23 = sbr.rel (!%p21_p2) target bundleno = 7 (0x7), region = 101 }
 0x31d   :  { %836 = vsyncpa [#allocation3], 1 }
 0x31e   :  { %838 = vsyncpa [#allocation3 + $0x1], 1 }
 0x31f   :  { %839 = vsyncpa [#allocation6], 1 }
 0x320   :  { %840 = vsyncpa [#allocation9], 1 }
 0x321   :  { %841 = vsyncpa [#allocation4], 1 }
 0x322   :  { %843 = vsyncpa [#allocation4 + $0x1], 1 }

</bundles_post_ra>
